<compile_context>
chip_gen: v5e
topology: v5e:2x2
jax: 0.10.0
libtpu: 0.0.40
codegen_flags: <defaults>
</compile_context>

<pallas_src>
import jax
import jax.numpy as jnp
from jax.experimental import pallas as pl
from jax.experimental.pallas import tpu as pltpu


def freenet_kernel(xt_ref, wx_ref, wrec_ref, b_ref, wout_ref, bout_ref, o_ref):
    """FreeNet forward for one batch tile (batch on the lane axis).

    xt_ref:   (D, TB)  VMEM  input tile, pre-transposed (bf16 or f32)
    wx_ref:   (n, D)   VMEM  input-side weights (same dtype as xt)
    wrec_ref: (n, n)   VMEM  recurrent weights, STRICTLY LOWER triangular, f32:
                             wrec[j, i] = weight of out_i inside neuron j (j > i)
    b_ref:    (n, 1)   VMEM  per-neuron biases, f32
    wout_ref: (n, 1)   VMEM  output Linear weight, f32
    bout_ref: (1, 1)   VMEM  output Linear bias, f32
    o_ref:    (1, TB)  VMEM  lane-dense output (batch on lanes), f32
    """
    n = wrec_ref.shape[0]

    # Input-side pre-activations for all neurons at once (single MXU matmul with
    # f32 accumulation), biases folded in.  acc[j, :] is neuron j's running
    # pre-activation; batch sits on lanes so everything below is lane-dense.
    acc = (
        jnp.dot(wx_ref[...], xt_ref[...], preferred_element_type=jnp.float32)
        + b_ref[...]
    )                                                        # (n, TB) f32

    wrec = wrec_ref[...]                                     # (n, n) f32, one vreg at n=8

    # Sequential neuron chain as forward rank-1 accumulation (pure VPU FMA).
    # Column i of wrec is zero in rows <= i, so finished rows receive exactly +0
    # and row i is final before iteration i reads it (cheap sublane slice).
    # TODO(synk): for large n (>~128), process neurons in K-sized chunks and push
    # each chunk's activations into later neurons with one MXU matmul per chunk
    # (bounds live ranges / spills); the flat unroll is optimal at n = 8.
    for i in range(n):
        s_i = acc[i : i + 1, :]                              # (1, TB) final pre-act of neuron i
        a_i = jnp.maximum(s_i, 0.0)
        a_i = a_i * a_i                                      # SquareReLU
        acc = acc + wrec[:, i : i + 1] * a_i                 # rank-1 column FMA

    # acc[j, :] is now neuron j's final pre-activation; recompute all activations
    # vectorized and apply the output Linear as a multiply + sublane reduction
    # (avoids an M=1 MXU matmul; the reduce rides the otherwise-idle XLU slot).
    outs = jnp.maximum(acc, 0.0)
    outs = outs * outs                                       # (n, TB)
    y = jnp.sum(wout_ref[...] * outs, axis=0, keepdims=True) + bout_ref[...]
    o_ref[...] = y.astype(o_ref.dtype)


def _round_up(v, m):
    return ((v + m - 1) // m) * m


# Explicit VMEM budgeting: the limit is above v5e's 16 MiB scoped default and well
# below v7x's 64 MiB physical VMEM (v5e/v6e have 128 MiB physical); tiles are sized
# against a smaller working budget to leave headroom.
_VMEM_LIMIT_BYTES = 48 * 1024 * 1024
_VMEM_TILE_BUDGET = 32 * 1024 * 1024


def _choose_batch_tile(B, D, n, block_b, in_bytes):
    """Pick a lane-dense batch tile (multiple of 128) sized against VMEM, keeping
    >= 2 grid steps when the batch allows it (dual-TC sharding on v7x)."""
    b128 = _round_up(max(B, 1), 128)
    # Bytes per batch column resident in VMEM: double-buffered x tile +
    # double-buffered f32 output row + in-kernel f32 working set (acc/outs/temps).
    per_col = 2 * D * in_bytes + 2 * 4 + 4 * n * 4
    tb_cap = max((_VMEM_TILE_BUDGET // per_col) // 128 * 128, 128)
    TB = min(b128, max(_round_up(block_b, 128), 128), tb_cap)
    if TB == b128 and b128 >= 256:
        # Single giant tile would serialize on one TensorCore on v7x; split it.
        TB = _round_up(b128 // 2, 128)
    Bp = _round_up(B, TB)
    return TB, Bp


def prepare_freenet_params(
    w_full, b, w_out, b_out, input_size, *, compute_dtype=jnp.bfloat16
):
    """Hoists all weight massaging (mask / transpose / cast) off the per-call path.

    `w_full` is the packed (n, input_size + n) per-neuron weight matrix: row i holds
    neuron i's Linear weight over [x, out_0..out_{i-1}]; the rest of the row is
    ignored (explicitly masked here, so results never depend on caller padding).
    Only the MXU operands use `compute_dtype`; the recurrent chain, biases and the
    output Linear stay f32 so the serial error does not compound.
    """
    D = input_size
    w_full = jnp.asarray(w_full, jnp.float32)
    n = w_full.shape[0]
    w_x = w_full[:, :D].astype(compute_dtype)                       # (n, D)
    w_rec = w_full[:, D : D + n]                                    # (n, n)
    w_rec = jnp.where(jnp.tril(jnp.ones((n, n), dtype=bool), k=-1), w_rec, 0.0)
    return dict(
        w_x=w_x,
        w_rec=w_rec,
        b=jnp.asarray(b, jnp.float32).reshape(n, 1),
        w_out=jnp.asarray(w_out, jnp.float32).reshape(n, 1),
        b_out=jnp.asarray(b_out, jnp.float32).reshape(1, 1),
        n=n,
        D=D,
        compute_dtype=compute_dtype,
    )


def freenet_forward(x, params, *, block_b=8192):
    """FreeNet forward. Returns a (B, 1) float32 array."""
    B, D = x.shape
    n = params["n"]
    assert D == params["D"], (D, params["D"])
    compute_dtype = params["compute_dtype"]
    in_bytes = jnp.dtype(compute_dtype).itemsize

    TB, Bp = _choose_batch_tile(B, D, n, block_b, in_bytes)

    # Stream x pre-transposed (batch on the lane axis) in the compute dtype.
    xt = jnp.asarray(x).astype(compute_dtype).T                     # (D, B)
    if Bp != B:
        xt = jnp.pad(xt, ((0, 0), (0, Bp - B)))

    y_row = pl.pallas_call(
        freenet_kernel,
        out_shape=jax.ShapeDtypeStruct((1, Bp), jnp.float32),
        grid=(Bp // TB,),
        in_specs=[
            pl.BlockSpec((D, TB), lambda i: (0, i)),                # x tile (pipelined over batch)
            # Constant-index weight blocks stay VMEM-resident across grid steps.
            # (Tiny at n=8; single-buffering them only matters at large n.)
            pl.BlockSpec((n, D), lambda i: (0, 0)),                 # Wx
            pl.BlockSpec((n, n), lambda i: (0, 0)),                 # Wrec (strictly lower-tri)
            pl.BlockSpec((n, 1), lambda i: (0, 0)),                 # biases
            pl.BlockSpec((n, 1), lambda i: (0, 0)),                 # output weight
            pl.BlockSpec((1, 1), lambda i: (0, 0)),                 # output bias
        ],
        out_specs=pl.BlockSpec((1, TB), lambda i: (0, i)),          # lane-dense output
        compiler_params=pltpu.CompilerParams(
            dimension_semantics=("parallel",),
            vmem_limit_bytes=_VMEM_LIMIT_BYTES,
        ),
    )(xt, params["w_x"], params["w_rec"], params["b"], params["w_out"], params["b_out"])

    return y_row[0, :B].reshape(B, 1)


def freenet_reference(x, w_full, b, w_out, b_out, *, input_dtype=jnp.float32):
    """Pure-JAX mirror of the PyTorch forward.

    With input_dtype=float32 this is the exact-f32 PyTorch semantics.  With
    input_dtype=bfloat16 it mirrors the kernel's mixed-precision contract (only the
    x-side term's operands are bf16; everything else stays f32)."""
    B, D = x.shape
    w_full = jnp.asarray(w_full, jnp.float32)
    n = w_full.shape[0]
    xin = jnp.asarray(x).astype(input_dtype).astype(jnp.float32)
    win = w_full[:, :D].astype(input_dtype).astype(jnp.float32)
    outs = []
    for i in range(n):
        s = jnp.sum(xin * win[i][None, :], axis=1, keepdims=True) + b[i]
        for k in range(i):
            s = s + outs[k] * w_full[i, D + k]
        a = jnp.maximum(s, 0.0)
        outs.append(a * a)
    final = jnp.concatenate(outs, axis=1)
    return jnp.sum(final * w_out, axis=1, keepdims=True) + b_out


if __name__ == "__main__":
    input_size = 16
    n = 8

    key = jax.random.PRNGKey(0)
    keys = jax.random.split(key, 2 * n + 3)

    # Deterministic init mimicking nn.Linear's U(-1/sqrt(fan_in), 1/sqrt(fan_in)),
    # packed into a zero-padded (n, input_size + n) matrix.
    w_full = jnp.zeros((n, input_size + n), jnp.float32)
    biases = []
    for i in range(n):
        fan_in = input_size + i
        bound = 1.0 / (fan_in ** 0.5)
        wi = jax.random.uniform(keys[2 * i], (fan_in,), jnp.float32, -bound, bound)
        bi = jax.random.uniform(keys[2 * i + 1], (), jnp.float32, -bound, bound)
        w_full = w_full.at[i, :fan_in].set(wi)
        biases.append(bi)
    b = jnp.stack(biases)                                           # (n,)

    bound_out = 1.0 / (n ** 0.5)
    w_out = jax.random.uniform(keys[2 * n], (1, n), jnp.float32, -bound_out, bound_out)
    b_out = jax.random.uniform(keys[2 * n + 1], (1,), jnp.float32, -bound_out, bound_out)

    # Weight prep is hoisted out of the per-call path (perf review item).
    params_f32 = prepare_freenet_params(
        w_full, b, w_out, b_out, input_size, compute_dtype=jnp.float32
    )
    params_bf16 = prepare_freenet_params(
        w_full, b, w_out, b_out, input_size, compute_dtype=jnp.bfloat16
    )

    x_small = jax.random.normal(keys[2 * n + 2], (2, input_size), jnp.float32)
    x_big = jax.random.normal(jax.random.PRNGKey(1), (300, input_size), jnp.float32)

    ref_small = freenet_reference(x_small, w_full, b, w_out, b_out)
    ref_big = freenet_reference(x_big, w_full, b, w_out, b_out)

    # (1) f32 path, single grid step (B=2 padded to one 128-lane tile).
    out_small = jax.block_until_ready(freenet_forward(x_small, params_f32))
    assert out_small.shape == (2, 1)
    assert jnp.allclose(out_small, ref_small, atol=2e-2, rtol=2e-2), (out_small, ref_small)

    # (2) f32 path, multi-step "parallel" grid (300 rows -> 128-lane tiles, padded
    # to 384): exercises pipelining, padding and the lane-dense out spec.
    out_big32 = jax.block_until_ready(freenet_forward(x_big, params_f32, block_b=128))
    assert out_big32.shape == (300, 1)
    assert jnp.allclose(out_big32, ref_big, atol=2e-2, rtol=2e-2), float(
        jnp.max(jnp.abs(out_big32 - ref_big))
    )

    # (3) Default bf16-streamed path (HBM-roofline win; exercises the >=2-step TB
    # split).  Checked tightly against a reference that applies the identical
    # mixed-precision contract (bf16 x/Wx operands, everything else f32).
    out_big16 = jax.block_until_ready(freenet_forward(x_big, params_bf16))
    ref_big16 = freenet_reference(
        x_big, w_full, b, w_out, b_out, input_dtype=jnp.bfloat16
    )
    assert out_big16.shape == (300, 1)
    assert jnp.allclose(out_big16, ref_big16, atol=2e-2, rtol=2e-2), float(
        jnp.max(jnp.abs(out_big16 - ref_big16))
    )

    print("KERNEL_OK")
</pallas_src>

<mosaic_0001>
module attributes {stable_mosaic.version = 11 : i64} {
  func.func @freenet_kernel(%arg0: i32, %arg1: memref<16x128xf32, #tpu.memory_space<vmem>>, %arg2: memref<8x16xf32, #tpu.memory_space<vmem>>, %arg3: memref<8x8xf32, #tpu.memory_space<vmem>>, %arg4: memref<8x1xf32, #tpu.memory_space<vmem>>, %arg5: memref<8x1xf32, #tpu.memory_space<vmem>>, %arg6: memref<1x1xf32, #tpu.memory_space<vmem>>, %arg7: memref<1x128xf32, #tpu.memory_space<vmem>>) attributes {dimension_semantics = [#tpu.dimension_semantics<parallel>], iteration_bounds = array<i64: 1>, scalar_prefetch = 0 : i64, scratch_operands = 0 : i64, tpu.core_type = #tpu.core_type<tc>, window_params = [{transform_indices = @transform_0, window_bounds = array<i64: 16, 128>}, {pipeline_mode = #tpu.pipeline_mode<synchronous>, transform_indices = @transform_1, window_bounds = array<i64: 8, 16>}, {pipeline_mode = #tpu.pipeline_mode<synchronous>, transform_indices = @transform_2, window_bounds = array<i64: 8, 8>}, {pipeline_mode = #tpu.pipeline_mode<synchronous>, transform_indices = @transform_3, window_bounds = array<i64: 8, 1>}, {pipeline_mode = #tpu.pipeline_mode<synchronous>, transform_indices = @transform_4, window_bounds = array<i64: 8, 1>}, {pipeline_mode = #tpu.pipeline_mode<synchronous>, transform_indices = @transform_5, window_bounds = array<i64: 1, 1>}, {transform_indices = @transform_6, window_bounds = array<i64: 1, 128>}]} {
    %c0 = arith.constant 0 : index
    %c0_0 = arith.constant 0 : index
    %0 = vector.load %arg2[%c0, %c0_0] : memref<8x16xf32, #tpu.memory_space<vmem>>, vector<8x16xf32>
    %c0_1 = arith.constant 0 : index
    %c0_2 = arith.constant 0 : index
    %1 = vector.load %arg1[%c0_1, %c0_2] : memref<16x128xf32, #tpu.memory_space<vmem>>, vector<16x128xf32>
    %cst = arith.constant dense<0.000000e+00> : vector<8x128xf32>
    %2 = tpu.matmul %0, %1, %cst {dimension_numbers = #tpu.dot_dimension_numbers<[1], [0], [0], [1], [0, 0, 1, 1], [], []>} : vector<8x16xf32>, vector<16x128xf32>, vector<8x128xf32> -> vector<8x128xf32>
    %c0_3 = arith.constant 0 : index
    %c0_4 = arith.constant 0 : index
    %3 = vector.load %arg4[%c0_3, %c0_4] : memref<8x1xf32, #tpu.memory_space<vmem>>, vector<8x1xf32>
    %4 = vector.broadcast %3 : vector<8x1xf32> to vector<8x128xf32>
    %5 = arith.addf %2, %4 : vector<8x128xf32>
    %c0_5 = arith.constant 0 : index
    %c0_6 = arith.constant 0 : index
    %6 = vector.load %arg3[%c0_5, %c0_6] : memref<8x8xf32, #tpu.memory_space<vmem>>, vector<8x8xf32>
    %7 = vector.extract_strided_slice %5 {offsets = [0, 0], sizes = [1, 128], strides = [1, 1]} : vector<8x128xf32> to vector<1x128xf32>
    %cst_7 = arith.constant 0.000000e+00 : f32
    %8 = vector.broadcast %cst_7 : f32 to vector<1x128xf32>
    %9 = arith.maximumf %7, %8 : vector<1x128xf32>
    %10 = arith.mulf %9, %9 : vector<1x128xf32>
    %11 = vector.extract_strided_slice %6 {offsets = [0, 0], sizes = [8, 1], strides = [1, 1]} : vector<8x8xf32> to vector<8x1xf32>
    %12 = vector.broadcast %11 : vector<8x1xf32> to vector<8x128xf32>
    %13 = vector.broadcast %10 : vector<1x128xf32> to vector<8x128xf32>
    %14 = arith.mulf %12, %13 : vector<8x128xf32>
    %15 = arith.addf %5, %14 : vector<8x128xf32>
    %16 = vector.extract_strided_slice %15 {offsets = [1, 0], sizes = [1, 128], strides = [1, 1]} : vector<8x128xf32> to vector<1x128xf32>
    %cst_8 = arith.constant 0.000000e+00 : f32
    %17 = vector.broadcast %cst_8 : f32 to vector<1x128xf32>
    %18 = arith.maximumf %16, %17 : vector<1x128xf32>
    %19 = arith.mulf %18, %18 : vector<1x128xf32>
    %20 = vector.extract_strided_slice %6 {offsets = [0, 1], sizes = [8, 1], strides = [1, 1]} : vector<8x8xf32> to vector<8x1xf32>
    %21 = vector.broadcast %20 : vector<8x1xf32> to vector<8x128xf32>
    %22 = vector.broadcast %19 : vector<1x128xf32> to vector<8x128xf32>
    %23 = arith.mulf %21, %22 : vector<8x128xf32>
    %24 = arith.addf %15, %23 : vector<8x128xf32>
    %25 = vector.extract_strided_slice %24 {offsets = [2, 0], sizes = [1, 128], strides = [1, 1]} : vector<8x128xf32> to vector<1x128xf32>
    %cst_9 = arith.constant 0.000000e+00 : f32
    %26 = vector.broadcast %cst_9 : f32 to vector<1x128xf32>
    %27 = arith.maximumf %25, %26 : vector<1x128xf32>
    %28 = arith.mulf %27, %27 : vector<1x128xf32>
    %29 = vector.extract_strided_slice %6 {offsets = [0, 2], sizes = [8, 1], strides = [1, 1]} : vector<8x8xf32> to vector<8x1xf32>
    %30 = vector.broadcast %29 : vector<8x1xf32> to vector<8x128xf32>
    %31 = vector.broadcast %28 : vector<1x128xf32> to vector<8x128xf32>
    %32 = arith.mulf %30, %31 : vector<8x128xf32>
    %33 = arith.addf %24, %32 : vector<8x128xf32>
    %34 = vector.extract_strided_slice %33 {offsets = [3, 0], sizes = [1, 128], strides = [1, 1]} : vector<8x128xf32> to vector<1x128xf32>
    %cst_10 = arith.constant 0.000000e+00 : f32
    %35 = vector.broadcast %cst_10 : f32 to vector<1x128xf32>
    %36 = arith.maximumf %34, %35 : vector<1x128xf32>
    %37 = arith.mulf %36, %36 : vector<1x128xf32>
    %38 = vector.extract_strided_slice %6 {offsets = [0, 3], sizes = [8, 1], strides = [1, 1]} : vector<8x8xf32> to vector<8x1xf32>
    %39 = vector.broadcast %38 : vector<8x1xf32> to vector<8x128xf32>
    %40 = vector.broadcast %37 : vector<1x128xf32> to vector<8x128xf32>
    %41 = arith.mulf %39, %40 : vector<8x128xf32>
    %42 = arith.addf %33, %41 : vector<8x128xf32>
    %43 = vector.extract_strided_slice %42 {offsets = [4, 0], sizes = [1, 128], strides = [1, 1]} : vector<8x128xf32> to vector<1x128xf32>
    %cst_11 = arith.constant 0.000000e+00 : f32
    %44 = vector.broadcast %cst_11 : f32 to vector<1x128xf32>
    %45 = arith.maximumf %43, %44 : vector<1x128xf32>
    %46 = arith.mulf %45, %45 : vector<1x128xf32>
    %47 = vector.extract_strided_slice %6 {offsets = [0, 4], sizes = [8, 1], strides = [1, 1]} : vector<8x8xf32> to vector<8x1xf32>
    %48 = vector.broadcast %47 : vector<8x1xf32> to vector<8x128xf32>
    %49 = vector.broadcast %46 : vector<1x128xf32> to vector<8x128xf32>
    %50 = arith.mulf %48, %49 : vector<8x128xf32>
    %51 = arith.addf %42, %50 : vector<8x128xf32>
    %52 = vector.extract_strided_slice %51 {offsets = [5, 0], sizes = [1, 128], strides = [1, 1]} : vector<8x128xf32> to vector<1x128xf32>
    %cst_12 = arith.constant 0.000000e+00 : f32
    %53 = vector.broadcast %cst_12 : f32 to vector<1x128xf32>
    %54 = arith.maximumf %52, %53 : vector<1x128xf32>
    %55 = arith.mulf %54, %54 : vector<1x128xf32>
    %56 = vector.extract_strided_slice %6 {offsets = [0, 5], sizes = [8, 1], strides = [1, 1]} : vector<8x8xf32> to vector<8x1xf32>
    %57 = vector.broadcast %56 : vector<8x1xf32> to vector<8x128xf32>
    %58 = vector.broadcast %55 : vector<1x128xf32> to vector<8x128xf32>
    %59 = arith.mulf %57, %58 : vector<8x128xf32>
    %60 = arith.addf %51, %59 : vector<8x128xf32>
    %61 = vector.extract_strided_slice %60 {offsets = [6, 0], sizes = [1, 128], strides = [1, 1]} : vector<8x128xf32> to vector<1x128xf32>
    %cst_13 = arith.constant 0.000000e+00 : f32
    %62 = vector.broadcast %cst_13 : f32 to vector<1x128xf32>
    %63 = arith.maximumf %61, %62 : vector<1x128xf32>
    %64 = arith.mulf %63, %63 : vector<1x128xf32>
    %65 = vector.extract_strided_slice %6 {offsets = [0, 6], sizes = [8, 1], strides = [1, 1]} : vector<8x8xf32> to vector<8x1xf32>
    %66 = vector.broadcast %65 : vector<8x1xf32> to vector<8x128xf32>
    %67 = vector.broadcast %64 : vector<1x128xf32> to vector<8x128xf32>
    %68 = arith.mulf %66, %67 : vector<8x128xf32>
    %69 = arith.addf %60, %68 : vector<8x128xf32>
    %70 = vector.extract_strided_slice %69 {offsets = [7, 0], sizes = [1, 128], strides = [1, 1]} : vector<8x128xf32> to vector<1x128xf32>
    %cst_14 = arith.constant 0.000000e+00 : f32
    %71 = vector.broadcast %cst_14 : f32 to vector<1x128xf32>
    %72 = arith.maximumf %70, %71 : vector<1x128xf32>
    %73 = arith.mulf %72, %72 : vector<1x128xf32>
    %74 = vector.extract_strided_slice %6 {offsets = [0, 7], sizes = [8, 1], strides = [1, 1]} : vector<8x8xf32> to vector<8x1xf32>
    %75 = vector.broadcast %74 : vector<8x1xf32> to vector<8x128xf32>
    %76 = vector.broadcast %73 : vector<1x128xf32> to vector<8x128xf32>
    %77 = arith.mulf %75, %76 : vector<8x128xf32>
    %78 = arith.addf %69, %77 : vector<8x128xf32>
    %cst_15 = arith.constant 0.000000e+00 : f32
    %79 = vector.broadcast %cst_15 : f32 to vector<8x128xf32>
    %80 = arith.maximumf %78, %79 : vector<8x128xf32>
    %81 = arith.mulf %80, %80 : vector<8x128xf32>
    %c0_16 = arith.constant 0 : index
    %c0_17 = arith.constant 0 : index
    %82 = vector.load %arg5[%c0_16, %c0_17] : memref<8x1xf32, #tpu.memory_space<vmem>>, vector<8x1xf32>
    %83 = vector.broadcast %82 : vector<8x1xf32> to vector<8x128xf32>
    %84 = arith.mulf %83, %81 : vector<8x128xf32>
    %cst_18 = arith.constant dense<0.000000e+00> : vector<128xf32>
    %85 = vector.multi_reduction <add>, %84, %cst_18 [0] : vector<8x128xf32> to vector<128xf32>
    %86 = vector.shape_cast %85 : vector<128xf32> to vector<1x128xf32>
    %c0_19 = arith.constant 0 : index
    %c0_20 = arith.constant 0 : index
    %87 = vector.load %arg6[%c0_19, %c0_20] : memref<1x1xf32, #tpu.memory_space<vmem>>, vector<1x1xf32>
    %88 = vector.broadcast %87 : vector<1x1xf32> to vector<1x128xf32>
    %89 = arith.addf %86, %88 : vector<1x128xf32>
    %c0_21 = arith.constant 0 : index
    %c0_22 = arith.constant 0 : index
    %90 = vector.load %arg7[%c0_21, %c0_22] : memref<1x128xf32, #tpu.memory_space<vmem>>, vector<1x128xf32>
    tpu.vector_store %arg7[%c0_21, %c0_22], %89 {strides = array<i32>} : memref<1x128xf32, #tpu.memory_space<vmem>>, vector<1x128xf32>,
    return
  }
  func.func @transform_0(%arg0: i32) -> (i32, i32) {
    %c0_i32 = arith.constant 0 : i32
    %c0_i32_0 = arith.constant 0 : i32
    return %c0_i32, %arg0 : i32, i32
  }
  func.func @transform_1(%arg0: i32) -> (i32, i32) {
    %c0_i32 = arith.constant 0 : i32
    %c0_i32_0 = arith.constant 0 : i32
    %c0_i32_1 = arith.constant 0 : i32
    return %c0_i32, %c0_i32_0 : i32, i32
  }
  func.func @transform_2(%arg0: i32) -> (i32, i32) {
    %c0_i32 = arith.constant 0 : i32
    %c0_i32_0 = arith.constant 0 : i32
    %c0_i32_1 = arith.constant 0 : i32
    return %c0_i32, %c0_i32_0 : i32, i32
  }
  func.func @transform_3(%arg0: i32) -> (i32, i32) {
    %c0_i32 = arith.constant 0 : i32
    %c0_i32_0 = arith.constant 0 : i32
    %c0_i32_1 = arith.constant 0 : i32
    return %c0_i32, %c0_i32_0 : i32, i32
  }
  func.func @transform_4(%arg0: i32) -> (i32, i32) {
    %c0_i32 = arith.constant 0 : i32
    %c0_i32_0 = arith.constant 0 : i32
    %c0_i32_1 = arith.constant 0 : i32
    return %c0_i32, %c0_i32_0 : i32, i32
  }
  func.func @transform_5(%arg0: i32) -> (i32, i32) {
    %c0_i32 = arith.constant 0 : i32
    %c0_i32_0 = arith.constant 0 : i32
    %c0_i32_1 = arith.constant 0 : i32
    return %c0_i32, %c0_i32_0 : i32, i32
  }
  func.func @transform_6(%arg0: i32) -> (i32, i32) {
    %c0_i32 = arith.constant 0 : i32
    %c0_i32_0 = arith.constant 0 : i32
    return %c0_i32, %arg0 : i32, i32
  }
}

</mosaic_0001>

<bundles_post_ra>
// kernel: tpu_custom_call.1
= control target key start
LH: loop header
LB: loop body
LE: loop exit
PB: predicated region body
PF: predicated region fallthrough
CT: control target
= control target key end

     0   :  { %s374_s0 = inlined_call_operand.vmem [shape: f32[16,128], index: 0, kind: input, shape index: {}]   ;;  %s375_s1 = inlined_call_operand.hbm [shape: f32[8,16], index: 1, kind: input, shape index: {}]   ;;  %s376_s2 = inlined_call_operand.hbm [shape: f32[8,8], index: 2, kind: input, shape index: {}]   ;;  %s377_s3 = inlined_call_operand.vmem [shape: f32[8,1], index: 3, kind: input, shape index: {}]   ;;  %s378_s4 = inlined_call_operand.vmem [shape: f32[8,1], index: 4, kind: input, shape index: {}]   ;;  %s379_s5 = inlined_call_operand.<no memory space> [shape: f32[1,1], index: 5, kind: input, shape index: {}]   ;;  %s380_s6 = inlined_call_operand.hbm [shape: f32[1,128], index: 6, kind: output, shape index: {}]  }
   0x1   :  { %v11_v0 = vstv %s379_s5 }
   0x2   :  { %12 = vst [vmem:[#allocation2] sm:$0x1] %v11_v0 }
   0x3   :  { %13 = vsyncpa [#allocation4], 0 }
   0x4   :  { %14 = vsyncpa [#allocation7], 0 }
   0x5   :  { %15 = vsyncpa [#allocation5], 0  ;;  %s23_s25 = sshll.u32 %s375_s1, 4  ;;  %s304_s26 = smov [#allocation3]   ;;  %s24_s25 = int_to_ptr.hbm [resolvable:$true] %s23_s25 }
   0x6   :  { %s25_s27 = sshll.u32 %s304_s26, 4  ;;  %s34_s30 = sshll.u32 %s376_s2, 4  ;;  %s26_s27 = int_to_ptr.vmem [resolvable:$true] %s25_s27  ;;  %s35_s30 = int_to_ptr.hbm [resolvable:$true] %s34_s30 }
   0x7   :  { %28 = dma.hbm_to_vmem [thread:$0]  %s24_s25, 128, %s26_s27, [#allocation4]  }
   0x8   :  { %s305_s7 = smov [#allocation6]  }
   0x9   :  { %s36_s5 = sshll.u32 %s305_s7, 4  ;;  %s37_s5 = int_to_ptr.vmem [resolvable:$true] %s36_s5 }
   0xa   :  { %39 = dma.hbm_to_vmem [thread:$0]  %s35_s30, 128, %s37_s5, [#allocation7]  }
   0xb   :  { %298 = dma.done.wait [#allocation4], 128  }
   0xc   :  { %299 = vsyncadd [#allocation4], 4294967168 }
   0xd   :  { %300 = dma.done.wait [#allocation7], 128  }
   0xe   :  { %301 = vsyncadd [#allocation7], 4294967168  ;;  %v306_v1 = vmov 0   ;;  %v307_v2 = vmov 1   ;;  %v308_v3 = vmov 3   ;;  %v56_v4 = vld [vmem:[%s374_s0 + $0x8] sm:$0xff] }
   0xf   :  { %215 = vset.pattern.permute.xlu0 %v306_v1  ;;  %216 = vset.pattern.permute.xlu1 %v307_v2  ;;  %v55_v5 = vld [vmem:[%s374_s0] sm:$0xff]  ;;  %vm63_vm0 = vcmask 130048   ;;  %v87_v8 = vld [vmem:[#allocation6] sm:$0xff]  ;;  %v309_v9 = vmov 2   ;;  %v310_v10 = vmov 4   ;;  %v311_v11 = vmov 5  }
  0x10   :  { %218 = vset.pattern.permute.xlu2 %v308_v3  ;;  %81 = vmatpush.msra.mxu0 %v56_v4  ;;  %v54_v6 = vld [vmem:[#allocation3] sm:$0xff]  ;;  %v312_v12 = vmov 6   ;;  %v313_v13 = vmov 7   ;;  %v176_v15 = vld [vmem:[#allocation2] sm:$0x1]  ;;  %s192_s15 = sshll.u32 %s380_s6, 4  ;;  %s193_s15 = int_to_ptr.hbm [resolvable:$true] %s192_s15 }
  0x11   :  { %v57_v7 = vld [vmem:[%s377_s3] sm:$0xff]  ;;  %101 = vperm.xlu1 %216, %v87_v8   ;;  %119 = vperm.xlu2 %218, %v87_v8  }
  0x12   :  { %60 = vperm.xlu0 %215, %v57_v7   ;;  %82 = vmatpush.msra.mxu0 %v55_v5  ;;  %v163_v14 = vld [vmem:[%s378_s4] sm:$0xff]  ;;  %s314_s4 = smov [#allocation8]  }
  0x13   :  { %203 = vmatmul.msk.f32.vlgmr.msra.gmra.mxu0 %vm63_vm0, %v54_v6  ;;  %s190_s12 = sshll.u32 %s314_s4, 4  ;;  %s191_s12 = int_to_ptr.vmem [resolvable:$true] %s190_s12 }
  0x19   :  { %217 = vset.pattern.permute.xlu1 %v309_v9  ;;  %219 = vset.pattern.permute.xlu2 %v310_v10 }
  0x1a   :  { %92 = vperm.xlu0 %215, %v87_v8   ;;  %110 = vperm.xlu1 %217, %v87_v8  }
  0x1b   :  { %128 = vperm.xlu2 %219, %v87_v8  }
  0x22   :  { %220 = vset.pattern.permute.xlu0 %v311_v11  ;;  %221 = vset.pattern.permute.xlu1 %v312_v12 }
  0x23   :  { %137 = vperm.xlu0 %220, %v87_v8   ;;  %146 = vperm.xlu1 %221, %v87_v8  }
  0x24   :  { %222 = vset.pattern.permute.xlu2 %v313_v13 }
  0x25   :  { %155 = vperm.xlu2 %222, %v87_v8  }
  0x2b   :  { %225 = vset.pattern.permute.xlu0 %v306_v1  ;;  %223 = vset.pattern.permute.xlu1 %v306_v1 }
  0x2c   :  { %166 = vperm.xlu1 %223, %v163_v14  }
  0x2d   :  { %224 = vset.pattern.permute.xlu2 %v306_v1 }
  0x2e   :  { %179 = vperm.xlu2 %224, %v176_v15  }
  0x6b   :  { %v120_v39 = vpop.permute.xlu2 %119 }
  0x75   :  { %v129_v45 = vpop.permute.xlu2 %128 }
  0x7f   :  { %v156_v63 = vpop.permute.xlu2 %155 }
  0x83   :  { %v102_v27 = vpop.permute.xlu1 %101 }
  0x84   :  { %v61_v16 = vpop.permute.xlu0 %60 }
  0x88   :  { %v180_v10 = vpop.permute.xlu2 %179 }
  0x89   :  { %v182_v13 = vperm.slane %v180_v10, 0 }
  0x8c   :  { %v93_v22 = vpop.permute.xlu0 %92  ;;  %v111_v33 = vpop.permute.xlu1 %110 }
  0x90   :  { %v84_v17 = vpop.f32.mrf.mxu0 }
  0x91   :  { %v85_v18 = vadd.f32 %v84_v17, %v61_v16 }
  0x93   :  { %v88_v19 = vmax.f32 %v85_v18, 0.0 }
  0x95   :  { %v89_v20 = vmul.f32 %v88_v19, %v88_v19  ;;  %v138_v51 = vpop.permute.xlu0 %137  ;;  %v147_v57 = vpop.permute.xlu1 %146 }
  0x97   :  { %v95_v21 = vperm.slane %v89_v20, 0 }
  0x99   :  { %v96_v23 = vmul.f32 %v95_v21, %v93_v22 }
  0x9b   :  { %v97_v24 = vadd.f32 %v96_v23, %v85_v18 }
  0x9d   :  { %v98_v25 = vmax.f32 %v97_v24, 0.0 }
  0x9e   :  { %v167_v4 = vpop.permute.xlu1 %166 }
  0x9f   :  { %v99_v26 = vmul.f32 %v98_v25, %v98_v25 }
  0xa1   :  { %v104_v28 = vperm.slane %v99_v26, 1 }
  0xa3   :  { %v105_v29 = vmul.f32 %v104_v28, %v102_v27 }
  0xa5   :  { %v106_v30 = vadd.f32 %v105_v29, %v97_v24 }
  0xa7   :  { %v107_v31 = vmax.f32 %v106_v30, 0.0 }
  0xa9   :  { %v108_v32 = vmul.f32 %v107_v31, %v107_v31 }
  0xab   :  { %v113_v34 = vperm.slane %v108_v32, 2 }
  0xad   :  { %v114_v35 = vmul.f32 %v113_v34, %v111_v33 }
  0xaf   :  { %v115_v36 = vadd.f32 %v114_v35, %v106_v30 }
  0xb1   :  { %v116_v37 = vmax.f32 %v115_v36, 0.0 }
  0xb3   :  { %v117_v38 = vmul.f32 %v116_v37, %v116_v37 }
  0xb5   :  { %v122_v40 = vperm.slane %v117_v38, 3 }
  0xb7   :  { %v123_v41 = vmul.f32 %v122_v40, %v120_v39 }
  0xb9   :  { %v124_v42 = vadd.f32 %v123_v41, %v115_v36 }
  0xbb   :  { %v125_v43 = vmax.f32 %v124_v42, 0.0 }
  0xbd   :  { %v126_v44 = vmul.f32 %v125_v43, %v125_v43 }
  0xbf   :  { %v131_v46 = vperm.slane %v126_v44, 4 }
  0xc1   :  { %v132_v47 = vmul.f32 %v131_v46, %v129_v45 }
  0xc3   :  { %v133_v48 = vadd.f32 %v132_v47, %v124_v42 }
  0xc5   :  { %v134_v49 = vmax.f32 %v133_v48, 0.0 }
  0xc7   :  { %v135_v50 = vmul.f32 %v134_v49, %v134_v49 }
  0xc9   :  { %v140_v52 = vperm.slane %v135_v50, 5 }
  0xcb   :  { %v141_v53 = vmul.f32 %v140_v52, %v138_v51 }
  0xcd   :  { %v142_v54 = vadd.f32 %v141_v53, %v133_v48 }
  0xcf   :  { %v143_v55 = vmax.f32 %v142_v54, 0.0 }
  0xd1   :  { %v144_v56 = vmul.f32 %v143_v55, %v143_v55 }
  0xd3   :  { %v149_v58 = vperm.slane %v144_v56, 6 }
  0xd5   :  { %v150_v59 = vmul.f32 %v149_v58, %v147_v57 }
  0xd7   :  { %v151_v60 = vadd.f32 %v150_v59, %v142_v54 }
  0xd9   :  { %v152_v61 = vmax.f32 %v151_v60, 0.0 }
  0xdb   :  { %v153_v62 = vmul.f32 %v152_v61, %v152_v61 }
  0xdd   :  { %v158_v0 = vperm.slane %v153_v62, 7 }
  0xdf   :  { %v159_v1 = vmul.f32 %v158_v0, %v156_v63 }
  0xe1   :  { %v160_v2 = vadd.f32 %v159_v1, %v151_v60 }
  0xe3   :  { %v161_v3 = vmax.f32 %v160_v2, 0.0 }
  0xe5   :  { %v162_v5 = vmul.f32 %v161_v3, %v161_v3 }
  0xe7   :  { %v169_v6 = vmul.f32 %v167_v4, %v162_v5 }
  0xe9   :  { %v170_v7 = vrot.slane %v169_v6, 4 }
  0xeb   :  { %v171_v8 = vadd.f32 %v170_v7, %v169_v6 }
  0xed   :  { %v172_v9 = vrot.slane %v171_v8, 2 }
  0xef   :  { %v173_v11 = vadd.f32 %v172_v9, %v171_v8 }
  0xf1   :  { %v174_v12 = vrot.slane %v173_v11, 1 }
  0xf3   :  { %v175_v14 = vadd.f32 %v174_v12, %v173_v11 }
  0xf5   :  { %v183_v15 = vadd.f32 %v182_v13, %v175_v14 }
  0xf7   :  { %184 = vst [vmem:[#allocation8] sm:$0x1] %v183_v15 }
  0xf8   :  { %195 = dma.vmem_to_hbm [thread:$0]  %s191_s12, 16, %s193_s15, [#allocation5]  }
  0xf9   :  { %302 = dma.done.wait [#allocation5], 16  }
  0xfa   :  { %303 = vsyncadd [#allocation5], 4294967280 }
  0xfb   :  { %200 = vsyncpa [#allocation4], 1 }
  0xfc   :  { %201 = vsyncpa [#allocation7], 1 }
  0xfd   :  { %202 = vsyncpa [#allocation5], 1 }

</bundles_post_ra>
